<compile_context>
chip_gen: v6e
topology: v6e:2x2x1
jax: 0.10.0
libtpu: 0.0.40
codegen_flags: <defaults>
</compile_context>

<pallas_src>
import jax
import jax.numpy as jnp
import numpy as np
from jax.experimental import pallas as pl
from jax.experimental.pallas import tpu as pltpu


def _make_fp_kernel(num_layers, has_points1, compute_dtype, k_neighbors=3):
    """Build the fused interpolation + MLP kernel for a fixed layer count."""

    def kernel(*refs):
        refs = list(refs)
        out_ref = refs.pop()                              # [1, d_out, tn]
        xyz1_ref = refs.pop(0)                            # [1, C, tn]  channel-first, f32
        xyz2_ref = refs.pop(0)                            # [1, S, C]   points-first (tiny), f32
        p1_ref = refs.pop(0) if has_points1 else None     # [1, D1, tn] compute_dtype
        p2_ref = refs.pop(0)                              # [1, D2, S]  compute_dtype
        param_refs = refs                                 # folded conv+BN weights / biases

        x1 = xyz1_ref[0]                                  # [C, tn] f32
        x2 = xyz2_ref[0]                                  # [S, C]  f32
        S = x2.shape[0]
        tn = x1.shape[1]

        # Squared pairwise distances in [S, tn] layout (query points on lanes),
        # same a^2 + b^2 - 2ab formula as square_distance() in torch, kept in f32.
        # maximum(.,0) guards against negative values from cancellation for
        # (near-)coincident points before the 1/(d+eps) weighting.
        x1sq = jnp.sum(x1 * x1, axis=0, keepdims=True)                      # [1, tn]
        x2sq = jnp.sum(x2 * x2, axis=-1, keepdims=True)                     # [S, 1]
        cross = jnp.dot(x2, x1, preferred_element_type=jnp.float32)         # [S, tn]
        d = jnp.maximum(x2sq + x1sq - 2.0 * cross, 0.0)                     # [S, tn]

        # 3 nearest neighbours via iterative masked min; ties broken by smallest
        # index (matching torch's stable sort) using the iota/min form (argmin_p
        # is not relied upon -- see header note).
        row = jax.lax.broadcasted_iota(jnp.int32, (S, tn), 0).astype(jnp.float32)
        wmat = jnp.zeros((S, tn), jnp.float32)
        wsum = jnp.zeros((1, tn), jnp.float32)
        dd = d
        for _ in range(k_neighbors):
            dmin = jnp.min(dd, axis=0, keepdims=True)                        # [1, tn]
            first = jnp.min(jnp.where(dd == dmin, row, float(S)),
                            axis=0, keepdims=True)                           # [1, tn]
            onehot = row == first                                            # [S, tn]
            wk = pl.reciprocal(dmin + 1e-8, approx=True)                     # EUP slot
            wmat = wmat + jnp.where(onehot, wk, 0.0)
            wsum = wsum + wk
            dd = jnp.where(onehot, jnp.float32(jnp.inf), dd)
        # Exact reciprocal for the normalisation: only [1, tn], tightens parity.
        wmat = wmat * (1.0 / wsum)

        # interpolated_points, channel-first: [D2, tn]  (gather == dense matmul).
        p2 = p2_ref[0]                                                       # [D2, S] compute_dtype
        interp = jnp.dot(p2, wmat.astype(compute_dtype),
                         preferred_element_type=jnp.float32)                 # [D2, tn]

        # MLP layer 0: torch `cat([points1, interpolated], -1)` + 1x1 conv is a
        # split matmul (no in-kernel concatenate).
        i = 0
        if has_points1:
            p1 = p1_ref[0]                                                   # [D1, tn] compute_dtype
            wa = param_refs[i][...]                                          # [C0, D1]
            wb = param_refs[i + 1][...]                                      # [C0, D2]
            bb = param_refs[i + 2][...]                                      # [C0, 1]
            i += 3
            h = (jnp.dot(wa, p1, preferred_element_type=jnp.float32)
                 + jnp.dot(wb, interp.astype(compute_dtype),
                           preferred_element_type=jnp.float32)
                 + bb)
        else:
            wb = param_refs[i][...]
            bb = param_refs[i + 1][...]
            i += 2
            h = jnp.dot(wb, interp.astype(compute_dtype),
                        preferred_element_type=jnp.float32) + bb
        h = jnp.maximum(h, 0.0)

        for _ in range(1, num_layers):
            w = param_refs[i][...]
            b = param_refs[i + 1][...]
            i += 2
            h = jnp.maximum(
                jnp.dot(w, h.astype(compute_dtype),
                        preferred_element_type=jnp.float32) + b, 0.0)

        out_ref[0] = h.astype(out_ref.dtype)                                 # [d_out, tn] lane-dense

    return kernel


def _vmem_capacity_bytes():
    """Physical VMEM per core, with a conservative (v7x-like) fallback."""
    try:
        info = pltpu.get_tpu_info()
        cap = int(getattr(info, "vmem_capacity_bytes", 0))
        if cap > 0:
            return cap
    except Exception:
        pass
    return 64 << 20


def _pick_tile_n(N, S, vmem_cap):
    """Generation-dependent tile width (lane axis), capped by the problem size."""
    if vmem_cap >= (100 << 20):        # v5e / v6e: 128 MiB physical VMEM
        t = 1024 if S <= 256 else 512
    else:                              # v7x: 64 MiB per TensorCore
        t = 256 if S < 512 else 128
    n_up = ((N + 127) // 128) * 128    # don't over-pad small N
    return max(128, min(t, n_up))


def pointnet_feature_propagation(xyz1, xyz2, points1, points2, folded_params,
                                 *, tile_n=None, compute_dtype=jnp.bfloat16,
                                 out_dtype=jnp.float32):
    """xyz1 [B,3,N], xyz2 [B,3,S], points1 [B,D1,N] or None, points2 [B,D2,S].
    folded_params: list of (W [out,in], b [out]) with eval-mode BN folded in.
    Returns [B, mlp[-1], N] (channel-first, like the torch module)."""
    xyz1 = xyz1.astype(jnp.float32)
    # Features stream in the compute dtype (bf16 by default): half the HBM->VMEM DMA
    # bytes and half the double-buffered VMEM; the MXU operands were bf16 anyway.
    points2 = points2.astype(compute_dtype)
    # xyz2 is the tiny sampled set; transposing it is negligible HBM traffic and keeps
    # every in-kernel matmul in the proven k-contracting MXU form.
    xyz2_sc = jnp.transpose(xyz2, (0, 2, 1)).astype(jnp.float32)             # [B, S, C]
    B, C, N = xyz1.shape
    S = xyz2_sc.shape[1]

    if S == 1:
        # torch `points2.repeat(1, N, 1)` branch: 3-NN over 3 identical copies
        # gives exactly the same result (equal weights summing to 1).
        xyz2_sc = jnp.tile(xyz2_sc, (1, 3, 1))
        points2 = jnp.tile(points2, (1, 1, 3))
        S = 3
    elif S == 2:
        # torch's sort + [:, :, :3] uses only the 2 real neighbours; emulate by
        # padding one far-away dummy point (zero features) whose normalised
        # weight is ~1e-25, i.e. numerically zero in f32.
        far = jnp.full((B, 1, C), 1e12, xyz2_sc.dtype)
        xyz2_sc = jnp.concatenate([xyz2_sc, far], axis=1)
        points2 = jnp.concatenate(
            [points2, jnp.zeros((B, points2.shape[1], 1), points2.dtype)], axis=2)
        S = 3
    assert S >= 3

    has_p1 = points1 is not None
    D2 = points2.shape[1]
    D1 = points1.shape[1] if has_p1 else 0
    d_out = folded_params[-1][0].shape[0]

    vmem_cap = _vmem_capacity_bytes()
    if tile_n is None:
        tile_n = _pick_tile_n(N, S, vmem_cap)
    assert tile_n % 128 == 0, "tile_n must be lane-dense (multiple of 128)"

    # Pad N up to a multiple of tile_n; padded query points are independent and
    # their (garbage) outputs are sliced off below.
    N_pad = ((N + tile_n - 1) // tile_n) * tile_n
    if N_pad != N:
        xyz1 = jnp.pad(xyz1, ((0, 0), (0, 0), (0, N_pad - N)))

    inputs = [xyz1, xyz2_sc]
    in_specs = [
        pl.BlockSpec((1, C, tile_n), lambda b, i: (b, 0, i)),
        pl.BlockSpec((1, S, C), lambda b, i: (b, 0, 0)),
    ]
    if has_p1:
        p1 = points1.astype(compute_dtype)
        if N_pad != N:
            p1 = jnp.pad(p1, ((0, 0), (0, 0), (0, N_pad - N)))
        inputs.append(p1)
        in_specs.append(pl.BlockSpec((1, D1, tile_n), lambda b, i: (b, 0, i)))
    inputs.append(points2)
    in_specs.append(pl.BlockSpec((1, D2, S), lambda b, i: (b, 0, 0)))

    # Flatten layer parameters (layer-0 weight split into the [.. D1 | D2 ..] halves).
    # Weights in compute_dtype; biases f32 columns.
    param_arrays = []
    W0, b0 = folded_params[0]
    if has_p1:
        param_arrays += [W0[:, :D1].astype(compute_dtype),
                         W0[:, D1:].astype(compute_dtype),
                         b0.reshape(-1, 1).astype(jnp.float32)]
    else:
        param_arrays += [W0.astype(compute_dtype),
                         b0.reshape(-1, 1).astype(jnp.float32)]
    for W, b in folded_params[1:]:
        param_arrays += [W.astype(compute_dtype),
                         b.reshape(-1, 1).astype(jnp.float32)]
    for p in param_arrays:
        in_specs.append(pl.BlockSpec(p.shape, lambda b, i: (0, 0)))
    inputs += param_arrays

    # Generation-aware VMEM budget: double-buffered streamed tiles, the per-batch
    # constant blocks, params, plus [S, tile_n] kNN temporaries and MLP activations.
    itm = jnp.dtype(compute_dtype).itemsize
    out_it = jnp.dtype(out_dtype).itemsize
    S_lane = ((S + 127) // 128) * 128
    widest = max([d_out, D2, D1] + [w.shape[0] for w, _ in folded_params])
    est = 2 * tile_n * (4 * C + itm * D1 + out_it * d_out)            # streamed blocks (x2 buffers)
    est += 2 * (4 * S * 128 + itm * D2 * S_lane)                      # per-batch constant blocks
    est += 2 * sum(int(p.size) * p.dtype.itemsize for p in param_arrays)
    est += 4 * S * tile_n * 9 + 4 * tile_n * widest * 6               # kNN + MLP temporaries
    if vmem_cap >= (100 << 20):
        cap = 100 << 20                                               # v5e / v6e
    else:
        cap = max(vmem_cap - (12 << 20), 32 << 20)                    # v7x headroom
    vmem_limit = int(min(max(int(1.3 * est), 16 << 20), cap))

    out = pl.pallas_call(
        _make_fp_kernel(len(folded_params), has_p1, compute_dtype),
        out_shape=jax.ShapeDtypeStruct((B, d_out, N_pad), out_dtype),
        grid=(B, N_pad // tile_n),
        in_specs=in_specs,
        out_specs=pl.BlockSpec((1, d_out, tile_n), lambda b, i: (b, 0, i)),
        compiler_params=pltpu.CompilerParams(
            dimension_semantics=("parallel", "parallel"),
            vmem_limit_bytes=vmem_limit),
    )(*inputs)
    return out[:, :, :N]                                                     # [B, D', N]


def reference_forward(xyz1, xyz2, points1, points2, folded_params):
    """Pure-JAX f32 mirror of the torch forward (eval-mode BN folded the same way)."""
    x1 = jnp.transpose(xyz1, (0, 2, 1))
    x2 = jnp.transpose(xyz2, (0, 2, 1))
    p2 = jnp.transpose(points2, (0, 2, 1))
    B, N, _ = x1.shape
    S = x2.shape[1]
    if S == 1:
        interp = jnp.tile(p2, (1, N, 1))
    else:
        d = (jnp.sum(x1 ** 2, -1)[:, :, None] + jnp.sum(x2 ** 2, -1)[:, None, :]
             - 2.0 * jnp.einsum('bnc,bmc->bnm', x1, x2))
        idx = jnp.argsort(d, axis=-1)[:, :, :3]
        dsel = jnp.take_along_axis(d, idx, axis=-1)
        w = 1.0 / (dsel + 1e-8)
        w = w / jnp.sum(w, axis=-1, keepdims=True)
        gathered = jax.vmap(lambda pts, ids: pts[ids])(p2, idx)   # [B, N, 3, D2]
        interp = jnp.sum(gathered * w[..., None], axis=2)
    if points1 is not None:
        p1 = jnp.transpose(points1, (0, 2, 1))
        h = jnp.concatenate([p1, interp], axis=-1)
    else:
        h = interp
    for W, b in folded_params:
        h = jnp.maximum(jnp.einsum('bnc,oc->bno', h, W) + b, 0.0)
    return jnp.transpose(h, (0, 2, 1))


if __name__ == "__main__":
    key = jax.random.PRNGKey(0)
    B, C, N, S = 2, 3, 64, 16
    D1, D2 = 6, 10
    mlp = [32, 16]
    in_channel = D1 + D2

    ks = jax.random.split(key, 16)
    xyz1 = jax.random.normal(ks[0], (B, C, N), jnp.float32)
    xyz2 = jax.random.normal(ks[1], (B, C, S), jnp.float32)
    points1 = jax.random.normal(ks[2], (B, D1, N), jnp.float32)
    points2 = jax.random.normal(ks[3], (B, D2, S), jnp.float32)

    # Deterministic Conv1d(k=1) + BatchNorm1d (eval-mode) parameters, folded.
    folded = []
    last = in_channel
    for li, out_c in enumerate(mlp):
        kw, kb, kg, kbe, km, kv = jax.random.split(ks[4 + li], 6)
        W = 0.1 * jax.random.normal(kw, (out_c, last), jnp.float32)
        b = 0.1 * jax.random.normal(kb, (out_c,), jnp.float32)
        gamma = 1.0 + 0.1 * jax.random.normal(kg, (out_c,), jnp.float32)
        beta = 0.1 * jax.random.normal(kbe, (out_c,), jnp.float32)
        rmean = 0.1 * jax.random.normal(km, (out_c,), jnp.float32)
        rvar = 1.0 + 0.5 * jax.random.uniform(kv, (out_c,), jnp.float32)
        scale = gamma / jnp.sqrt(rvar + 1e-5)
        folded.append((W * scale[:, None], (b - rmean) * scale + beta))
        last = out_c

    out = pointnet_feature_propagation(xyz1, xyz2, points1, points2, folded)
    out = jax.block_until_ready(out)
    assert out.shape == (B, mlp[-1], N)

    # Tolerance accounts for bf16 MXU operands / bf16-streamed features and the approx
    # (EUP) per-neighbour reciprocal versus the full-f32 reference; neighbour selection
    # itself is exact f32.
    ref = reference_forward(xyz1, xyz2, points1, points2, folded)
    np.testing.assert_allclose(np.asarray(out), np.asarray(ref),
                               atol=3e-2, rtol=3e-2)
    print("KERNEL_OK")
</pallas_src>

<mosaic_0001>
module attributes {stable_mosaic.version = 11 : i64} {
  func.func @kernel(%arg0: i32, %arg1: i32, %arg2: memref<1x3x128xf32, #tpu.memory_space<vmem>>, %arg3: memref<1x16x3xf32, #tpu.memory_space<vmem>>, %arg4: memref<1x6x128xbf16, #tpu.memory_space<vmem>>, %arg5: memref<1x10x16xbf16, #tpu.memory_space<vmem>>, %arg6: memref<32x6xbf16, #tpu.memory_space<vmem>>, %arg7: memref<32x10xbf16, #tpu.memory_space<vmem>>, %arg8: memref<32x1xf32, #tpu.memory_space<vmem>>, %arg9: memref<16x32xbf16, #tpu.memory_space<vmem>>, %arg10: memref<16x1xf32, #tpu.memory_space<vmem>>, %arg11: memref<1x16x128xf32, #tpu.memory_space<vmem>>) attributes {dimension_semantics = [#tpu.dimension_semantics<parallel>, #tpu.dimension_semantics<parallel>], iteration_bounds = array<i64: 2, 1>, scalar_prefetch = 0 : i64, scratch_operands = 0 : i64, tpu.core_type = #tpu.core_type<tc>, window_params = [{transform_indices = @transform_0, window_bounds = array<i64: 1, 3, 128>}, {transform_indices = @transform_1, window_bounds = array<i64: 1, 16, 3>}, {transform_indices = @transform_2, window_bounds = array<i64: 1, 6, 128>}, {transform_indices = @transform_3, window_bounds = array<i64: 1, 10, 16>}, {pipeline_mode = #tpu.pipeline_mode<synchronous>, transform_indices = @transform_4, window_bounds = array<i64: 32, 6>}, {pipeline_mode = #tpu.pipeline_mode<synchronous>, transform_indices = @transform_5, window_bounds = array<i64: 32, 10>}, {pipeline_mode = #tpu.pipeline_mode<synchronous>, transform_indices = @transform_6, window_bounds = array<i64: 32, 1>}, {pipeline_mode = #tpu.pipeline_mode<synchronous>, transform_indices = @transform_7, window_bounds = array<i64: 16, 32>}, {pipeline_mode = #tpu.pipeline_mode<synchronous>, transform_indices = @transform_8, window_bounds = array<i64: 16, 1>}, {transform_indices = @transform_9, window_bounds = array<i64: 1, 16, 128>}]} {
    %c0 = arith.constant 0 : index
    %c0_0 = arith.constant 0 : index
    %c0_1 = arith.constant 0 : index
    %0 = vector.load %arg2[%c0, %c0_0, %c0_1] : memref<1x3x128xf32, #tpu.memory_space<vmem>>, vector<1x3x128xf32>
    %1 = vector.shape_cast %0 : vector<1x3x128xf32> to vector<3x128xf32>
    %c0_2 = arith.constant 0 : index
    %c0_3 = arith.constant 0 : index
    %c0_4 = arith.constant 0 : index
    %2 = vector.load %arg3[%c0_2, %c0_3, %c0_4] : memref<1x16x3xf32, #tpu.memory_space<vmem>>, vector<1x16x3xf32>
    %3 = vector.shape_cast %2 : vector<1x16x3xf32> to vector<16x3xf32>
    %4 = arith.mulf %1, %1 : vector<3x128xf32>
    %cst = arith.constant dense<0.000000e+00> : vector<128xf32>
    %5 = vector.multi_reduction <add>, %4, %cst [0] : vector<3x128xf32> to vector<128xf32>
    %6 = vector.shape_cast %5 : vector<128xf32> to vector<1x128xf32>
    %7 = arith.mulf %3, %3 : vector<16x3xf32>
    %cst_5 = arith.constant dense<0.000000e+00> : vector<16xf32>
    %8 = vector.multi_reduction <add>, %7, %cst_5 [1] : vector<16x3xf32> to vector<16xf32>
    %9 = vector.shape_cast %8 : vector<16xf32> to vector<16x1xf32>
    %cst_6 = arith.constant dense<0.000000e+00> : vector<16x128xf32>
    %10 = tpu.matmul %3, %1, %cst_6 {dimension_numbers = #tpu.dot_dimension_numbers<[1], [0], [0], [1], [0, 0, 1, 1], [], []>} : vector<16x3xf32>, vector<3x128xf32>, vector<16x128xf32> -> vector<16x128xf32>
    %11 = vector.broadcast %9 : vector<16x1xf32> to vector<16x128xf32>
    %12 = vector.broadcast %6 : vector<1x128xf32> to vector<16x128xf32>
    %13 = arith.addf %11, %12 : vector<16x128xf32>
    %cst_7 = arith.constant 2.000000e+00 : f32
    %14 = vector.broadcast %cst_7 : f32 to vector<16x128xf32>
    %15 = arith.mulf %14, %10 : vector<16x128xf32>
    %16 = arith.subf %13, %15 : vector<16x128xf32>
    %cst_8 = arith.constant 0.000000e+00 : f32
    %17 = vector.broadcast %cst_8 : f32 to vector<16x128xf32>
    %18 = arith.maximumf %16, %17 : vector<16x128xf32>
    %19 = tpu.iota {dimensions = array<i32: 0>} : vector<16x128xi32>
    %20 = arith.sitofp %19 : vector<16x128xi32> to vector<16x128xf32>
    %cst_9 = arith.constant 0.000000e+00 : f32
    %21 = vector.broadcast %cst_9 : f32 to vector<16x128xf32>
    %cst_10 = arith.constant 0.000000e+00 : f32
    %22 = vector.broadcast %cst_10 : f32 to vector<1x128xf32>
    %cst_11 = arith.constant dense<0x7F800000> : vector<128xf32>
    %23 = vector.multi_reduction <minimumf>, %18, %cst_11 [0] : vector<16x128xf32> to vector<128xf32>
    %24 = vector.shape_cast %23 : vector<128xf32> to vector<1x128xf32>
    %25 = vector.broadcast %24 : vector<1x128xf32> to vector<16x128xf32>
    %26 = arith.cmpf oeq, %18, %25 : vector<16x128xf32>
    %cst_12 = arith.constant 1.600000e+01 : f32
    %27 = vector.broadcast %cst_12 : f32 to vector<16x128xf32>
    %28 = arith.select %26, %20, %27 : vector<16x128xi1>, vector<16x128xf32>
    %cst_13 = arith.constant dense<0x7F800000> : vector<128xf32>
    %29 = vector.multi_reduction <minimumf>, %28, %cst_13 [0] : vector<16x128xf32> to vector<128xf32>
    %30 = vector.shape_cast %29 : vector<128xf32> to vector<1x128xf32>
    %31 = vector.broadcast %30 : vector<1x128xf32> to vector<16x128xf32>
    %32 = arith.cmpf oeq, %20, %31 : vector<16x128xf32>
    %cst_14 = arith.constant 9.99999993E-9 : f32
    %33 = vector.broadcast %cst_14 : f32 to vector<1x128xf32>
    %34 = arith.addf %24, %33 : vector<1x128xf32>
    %35 = tpu.reciprocal %34 {approx = true} : vector<1x128xf32> -> vector<1x128xf32>
    %cst_15 = arith.constant 0.000000e+00 : f32
    %36 = vector.shape_cast %35 : vector<1x128xf32> to vector<1x128xf32>
    %37 = vector.broadcast %36 : vector<1x128xf32> to vector<16x128xf32>
    %38 = vector.broadcast %cst_15 : f32 to vector<16x128xf32>
    %39 = arith.select %32, %37, %38 : vector<16x128xi1>, vector<16x128xf32>
    %40 = arith.addf %21, %39 : vector<16x128xf32>
    %41 = arith.addf %22, %35 : vector<1x128xf32>
    %cst_16 = arith.constant 0x7F800000 : f32
    %42 = vector.broadcast %cst_16 : f32 to vector<16x128xf32>
    %43 = arith.select %32, %42, %18 : vector<16x128xi1>, vector<16x128xf32>
    %cst_17 = arith.constant dense<0x7F800000> : vector<128xf32>
    %44 = vector.multi_reduction <minimumf>, %43, %cst_17 [0] : vector<16x128xf32> to vector<128xf32>
    %45 = vector.shape_cast %44 : vector<128xf32> to vector<1x128xf32>
    %46 = vector.broadcast %45 : vector<1x128xf32> to vector<16x128xf32>
    %47 = arith.cmpf oeq, %43, %46 : vector<16x128xf32>
    %cst_18 = arith.constant 1.600000e+01 : f32
    %48 = vector.broadcast %cst_18 : f32 to vector<16x128xf32>
    %49 = arith.select %47, %20, %48 : vector<16x128xi1>, vector<16x128xf32>
    %cst_19 = arith.constant dense<0x7F800000> : vector<128xf32>
    %50 = vector.multi_reduction <minimumf>, %49, %cst_19 [0] : vector<16x128xf32> to vector<128xf32>
    %51 = vector.shape_cast %50 : vector<128xf32> to vector<1x128xf32>
    %52 = vector.broadcast %51 : vector<1x128xf32> to vector<16x128xf32>
    %53 = arith.cmpf oeq, %20, %52 : vector<16x128xf32>
    %cst_20 = arith.constant 9.99999993E-9 : f32
    %54 = vector.broadcast %cst_20 : f32 to vector<1x128xf32>
    %55 = arith.addf %45, %54 : vector<1x128xf32>
    %56 = tpu.reciprocal %55 {approx = true} : vector<1x128xf32> -> vector<1x128xf32>
    %cst_21 = arith.constant 0.000000e+00 : f32
    %57 = vector.shape_cast %56 : vector<1x128xf32> to vector<1x128xf32>
    %58 = vector.broadcast %57 : vector<1x128xf32> to vector<16x128xf32>
    %59 = vector.broadcast %cst_21 : f32 to vector<16x128xf32>
    %60 = arith.select %53, %58, %59 : vector<16x128xi1>, vector<16x128xf32>
    %61 = arith.addf %40, %60 : vector<16x128xf32>
    %62 = arith.addf %41, %56 : vector<1x128xf32>
    %cst_22 = arith.constant 0x7F800000 : f32
    %63 = vector.broadcast %cst_22 : f32 to vector<16x128xf32>
    %64 = arith.select %53, %63, %43 : vector<16x128xi1>, vector<16x128xf32>
    %cst_23 = arith.constant dense<0x7F800000> : vector<128xf32>
    %65 = vector.multi_reduction <minimumf>, %64, %cst_23 [0] : vector<16x128xf32> to vector<128xf32>
    %66 = vector.shape_cast %65 : vector<128xf32> to vector<1x128xf32>
    %67 = vector.broadcast %66 : vector<1x128xf32> to vector<16x128xf32>
    %68 = arith.cmpf oeq, %64, %67 : vector<16x128xf32>
    %cst_24 = arith.constant 1.600000e+01 : f32
    %69 = vector.broadcast %cst_24 : f32 to vector<16x128xf32>
    %70 = arith.select %68, %20, %69 : vector<16x128xi1>, vector<16x128xf32>
    %cst_25 = arith.constant dense<0x7F800000> : vector<128xf32>
    %71 = vector.multi_reduction <minimumf>, %70, %cst_25 [0] : vector<16x128xf32> to vector<128xf32>
    %72 = vector.shape_cast %71 : vector<128xf32> to vector<1x128xf32>
    %73 = vector.broadcast %72 : vector<1x128xf32> to vector<16x128xf32>
    %74 = arith.cmpf oeq, %20, %73 : vector<16x128xf32>
    %cst_26 = arith.constant 9.99999993E-9 : f32
    %75 = vector.broadcast %cst_26 : f32 to vector<1x128xf32>
    %76 = arith.addf %66, %75 : vector<1x128xf32>
    %77 = tpu.reciprocal %76 {approx = true} : vector<1x128xf32> -> vector<1x128xf32>
    %cst_27 = arith.constant 0.000000e+00 : f32
    %78 = vector.shape_cast %77 : vector<1x128xf32> to vector<1x128xf32>
    %79 = vector.broadcast %78 : vector<1x128xf32> to vector<16x128xf32>
    %80 = vector.broadcast %cst_27 : f32 to vector<16x128xf32>
    %81 = arith.select %74, %79, %80 : vector<16x128xi1>, vector<16x128xf32>
    %82 = arith.addf %61, %81 : vector<16x128xf32>
    %83 = arith.addf %62, %77 : vector<1x128xf32>
    %cst_28 = arith.constant 1.000000e+00 : f32
    %84 = vector.broadcast %cst_28 : f32 to vector<1x128xf32>
    %85 = arith.divf %84, %83 : vector<1x128xf32>
    %86 = vector.broadcast %85 : vector<1x128xf32> to vector<16x128xf32>
    %87 = arith.mulf %82, %86 : vector<16x128xf32>
    %c0_29 = arith.constant 0 : index
    %c0_30 = arith.constant 0 : index
    %c0_31 = arith.constant 0 : index
    %88 = vector.load %arg5[%c0_29, %c0_30, %c0_31] : memref<1x10x16xbf16, #tpu.memory_space<vmem>>, vector<1x10x16xbf16>
    %89 = vector.shape_cast %88 : vector<1x10x16xbf16> to vector<10x16xbf16>
    %90 = arith.truncf %87 : vector<16x128xf32> to vector<16x128xbf16>
    %cst_32 = arith.constant dense<0.000000e+00> : vector<10x128xf32>
    %91 = tpu.matmul %89, %90, %cst_32 {dimension_numbers = #tpu.dot_dimension_numbers<[1], [0], [0], [1], [0, 0, 1, 1], [], []>} : vector<10x16xbf16>, vector<16x128xbf16>, vector<10x128xf32> -> vector<10x128xf32>
    %c0_33 = arith.constant 0 : index
    %c0_34 = arith.constant 0 : index
    %c0_35 = arith.constant 0 : index
    %92 = vector.load %arg4[%c0_33, %c0_34, %c0_35] : memref<1x6x128xbf16, #tpu.memory_space<vmem>>, vector<1x6x128xbf16>
    %93 = vector.shape_cast %92 : vector<1x6x128xbf16> to vector<6x128xbf16>
    %c0_36 = arith.constant 0 : index
    %c0_37 = arith.constant 0 : index
    %94 = vector.load %arg6[%c0_36, %c0_37] : memref<32x6xbf16, #tpu.memory_space<vmem>>, vector<32x6xbf16>
    %c0_38 = arith.constant 0 : index
    %c0_39 = arith.constant 0 : index
    %95 = vector.load %arg7[%c0_38, %c0_39] : memref<32x10xbf16, #tpu.memory_space<vmem>>, vector<32x10xbf16>
    %c0_40 = arith.constant 0 : index
    %c0_41 = arith.constant 0 : index
    %96 = vector.load %arg8[%c0_40, %c0_41] : memref<32x1xf32, #tpu.memory_space<vmem>>, vector<32x1xf32>
    %cst_42 = arith.constant dense<0.000000e+00> : vector<32x128xf32>
    %97 = tpu.matmul %94, %93, %cst_42 {dimension_numbers = #tpu.dot_dimension_numbers<[1], [0], [0], [1], [0, 0, 1, 1], [], []>} : vector<32x6xbf16>, vector<6x128xbf16>, vector<32x128xf32> -> vector<32x128xf32>
    %98 = arith.truncf %91 : vector<10x128xf32> to vector<10x128xbf16>
    %cst_43 = arith.constant dense<0.000000e+00> : vector<32x128xf32>
    %99 = tpu.matmul %95, %98, %cst_43 {dimension_numbers = #tpu.dot_dimension_numbers<[1], [0], [0], [1], [0, 0, 1, 1], [], []>} : vector<32x10xbf16>, vector<10x128xbf16>, vector<32x128xf32> -> vector<32x128xf32>
    %100 = arith.addf %97, %99 : vector<32x128xf32>
    %101 = vector.broadcast %96 : vector<32x1xf32> to vector<32x128xf32>
    %102 = arith.addf %100, %101 : vector<32x128xf32>
    %cst_44 = arith.constant 0.000000e+00 : f32
    %103 = vector.broadcast %cst_44 : f32 to vector<32x128xf32>
    %104 = arith.maximumf %102, %103 : vector<32x128xf32>
    %c0_45 = arith.constant 0 : index
    %c0_46 = arith.constant 0 : index
    %105 = vector.load %arg9[%c0_45, %c0_46] : memref<16x32xbf16, #tpu.memory_space<vmem>>, vector<16x32xbf16>
    %c0_47 = arith.constant 0 : index
    %c0_48 = arith.constant 0 : index
    %106 = vector.load %arg10[%c0_47, %c0_48] : memref<16x1xf32, #tpu.memory_space<vmem>>, vector<16x1xf32>
    %107 = arith.truncf %104 : vector<32x128xf32> to vector<32x128xbf16>
    %cst_49 = arith.constant dense<0.000000e+00> : vector<16x128xf32>
    %108 = tpu.matmul %105, %107, %cst_49 {dimension_numbers = #tpu.dot_dimension_numbers<[1], [0], [0], [1], [0, 0, 1, 1], [], []>} : vector<16x32xbf16>, vector<32x128xbf16>, vector<16x128xf32> -> vector<16x128xf32>
    %109 = vector.broadcast %106 : vector<16x1xf32> to vector<16x128xf32>
    %110 = arith.addf %108, %109 : vector<16x128xf32>
    %cst_50 = arith.constant 0.000000e+00 : f32
    %111 = vector.broadcast %cst_50 : f32 to vector<16x128xf32>
    %112 = arith.maximumf %110, %111 : vector<16x128xf32>
    %c0_51 = arith.constant 0 : index
    %c0_52 = arith.constant 0 : index
    %c0_53 = arith.constant 0 : index
    %113 = vector.load %arg11[%c0_51, %c0_52, %c0_53] : memref<1x16x128xf32, #tpu.memory_space<vmem>>, vector<1x16x128xf32>
    %114 = vector.shape_cast %113 : vector<1x16x128xf32> to vector<16x128xf32>
    %115 = vector.shape_cast %112 : vector<16x128xf32> to vector<1x16x128xf32>
    tpu.vector_store %arg11[%c0_51, %c0_52, %c0_53], %115 {strides = array<i32>} : memref<1x16x128xf32, #tpu.memory_space<vmem>>, vector<1x16x128xf32>,
    return
  }
  func.func @transform_0(%arg0: i32, %arg1: i32) -> (i32, i32, i32) {
    %c0_i32 = arith.constant 0 : i32
    %c0_i32_0 = arith.constant 0 : i32
    return %arg0, %c0_i32, %arg1 : i32, i32, i32
  }
  func.func @transform_1(%arg0: i32, %arg1: i32) -> (i32, i32, i32) {
    %c0_i32 = arith.constant 0 : i32
    %c0_i32_0 = arith.constant 0 : i32
    %c0_i32_1 = arith.constant 0 : i32
    return %arg0, %c0_i32, %c0_i32_0 : i32, i32, i32
  }
  func.func @transform_2(%arg0: i32, %arg1: i32) -> (i32, i32, i32) {
    %c0_i32 = arith.constant 0 : i32
    %c0_i32_0 = arith.constant 0 : i32
    return %arg0, %c0_i32, %arg1 : i32, i32, i32
  }
  func.func @transform_3(%arg0: i32, %arg1: i32) -> (i32, i32, i32) {
    %c0_i32 = arith.constant 0 : i32
    %c0_i32_0 = arith.constant 0 : i32
    %c0_i32_1 = arith.constant 0 : i32
    return %arg0, %c0_i32, %c0_i32_0 : i32, i32, i32
  }
  func.func @transform_4(%arg0: i32, %arg1: i32) -> (i32, i32) {
    %c0_i32 = arith.constant 0 : i32
    %c0_i32_0 = arith.constant 0 : i32
    %c0_i32_1 = arith.constant 0 : i32
    return %c0_i32, %c0_i32_0 : i32, i32
  }
  func.func @transform_5(%arg0: i32, %arg1: i32) -> (i32, i32) {
    %c0_i32 = arith.constant 0 : i32
    %c0_i32_0 = arith.constant 0 : i32
    %c0_i32_1 = arith.constant 0 : i32
    return %c0_i32, %c0_i32_0 : i32, i32
  }
  func.func @transform_6(%arg0: i32, %arg1: i32) -> (i32, i32) {
    %c0_i32 = arith.constant 0 : i32
    %c0_i32_0 = arith.constant 0 : i32
    %c0_i32_1 = arith.constant 0 : i32
    return %c0_i32, %c0_i32_0 : i32, i32
  }
  func.func @transform_7(%arg0: i32, %arg1: i32) -> (i32, i32) {
    %c0_i32 = arith.constant 0 : i32
    %c0_i32_0 = arith.constant 0 : i32
    %c0_i32_1 = arith.constant 0 : i32
    return %c0_i32, %c0_i32_0 : i32, i32
  }
  func.func @transform_8(%arg0: i32, %arg1: i32) -> (i32, i32) {
    %c0_i32 = arith.constant 0 : i32
    %c0_i32_0 = arith.constant 0 : i32
    %c0_i32_1 = arith.constant 0 : i32
    return %c0_i32, %c0_i32_0 : i32, i32
  }
  func.func @transform_9(%arg0: i32, %arg1: i32) -> (i32, i32, i32) {
    %c0_i32 = arith.constant 0 : i32
    %c0_i32_0 = arith.constant 0 : i32
    return %arg0, %c0_i32, %arg1 : i32, i32, i32
  }
}

</mosaic_0001>

<bundles_post_ra>
// kernel: tpu_custom_call.1
= control target key start
LH: loop header
LB: loop body
LE: loop exit
PB: predicated region body
PF: predicated region fallthrough
CT: control target
= control target key end

     0   :  { %14 = vsyncpa [#allocation3], 0  ;;  %s1552_s0 = inlined_call_operand.vmem [shape: f32[2,3,128], index: 0, kind: input, shape index: {}]   ;;  %s1553_s1 = inlined_call_operand.vmem [shape: f32[2,16,3], index: 1, kind: input, shape index: {}]   ;;  %s1554_s2 = inlined_call_operand.vmem [shape: bf16[2,6,128], index: 2, kind: input, shape index: {}]   ;;  %s1555_s3 = inlined_call_operand.vmem [shape: bf16[2,10,16], index: 3, kind: input, shape index: {}]   ;;  %s1556_s4 = inlined_call_operand.vmem [shape: bf16[32,6], index: 4, kind: input, shape index: {}]   ;;  %s1557_s5 = inlined_call_operand.vmem [shape: bf16[32,10], index: 5, kind: input, shape index: {}]   ;;  %s1558_s6 = inlined_call_operand.vmem [shape: f32[32,1], index: 6, kind: input, shape index: {}]   ;;  %s1559_s7 = inlined_call_operand.vmem [shape: bf16[16,32], index: 7, kind: input, shape index: {}]   ;;  %s1560_s8 = inlined_call_operand.vmem [shape: f32[16,1], index: 8, kind: input, shape index: {}]   ;;  %s1561_s9 = inlined_call_operand.hbm [shape: f32[2,16,128], index: 9, kind: output, shape index: {}]  }
   0x1   :  { %16 = vsyncpa [#allocation3 + $0x1], 0  ;;  %s1354_s30 = smov 0   ;;  %s1356_s10 = smov 0  }
   0x2   :  { %s1358_s11 = smov 0   ;;  %s1360_s12 = smov 0  }
   0x3   :  { %s1362_s13 = smov 0   ;;  %s1364_s14 = smov 0  }
   0x4 LB: > { %s1062_s15 = sadd.s32 4294967295, %s1296_s14   ;;  %s1063_s16 = sadd.s32 4294967294, %s1296_s14   ;;  %s1296_s14 = sphi %s1364_s14, %s22_s14   ;;  %s1292_s13 = sphi %s1362_s13, %s1568_s13   ;;  %s1288_s12 = sphi %s1360_s12, %s1567_s12   ;;  %s1284_s11 = sphi %s1358_s11, %s1566_s11   ;;  %s1280_s10 = sphi %s1356_s10, %s1565_s10   ;;  %s1276_s30 = sphi %s1354_s30, %s1564_s30  }
   0x5   : > { %s34_s17 = sadd.s32 1, %s1292_s13  ;;  %s256_s18 = sadd.s32 1, %s1284_s11 }
   0x6   : > { %p36_p0 = scmp.ge.s32.totalorder %s34_s17, 2  ;;  %p266_p1 = scmp.ne.s32.totalorder %s1284_s11, %s1280_s10 }
   0x7   : > { %p267_p2 = scmp.eq.s32.totalorder %s1062_s15, 1  ;;  %p272_p3 = scmp.ne.s32.totalorder %s1280_s10, %s1276_s30 }
   0x8   : > { %s1570_s17 = smov (%p36_p0, %s34_s17), 0  ;;  %p273_p5 = scmp.eq.s32.totalorder %s1063_s16, 1 }
   0x9   : > { %p1394_p4 = por %p267_p2, %p266_p1  ;;  %s251_s20 = ssub.s32 %s1292_s13, %s1570_s17 }
   0xa   : > { %p1066_p6 = scmp.ge.s32.totalorder %s1296_s14, 1  ;;  %p254_p7 = scmp.eq.s32.totalorder %s251_s20, 0 }
   0xb   : > { %p1401_p8 = por %p273_p5, %p272_p3  ;;  %p342_p9 = scmp.lt.s32.totalorder %s1296_s14, 3 }
   0xc   : > { %s1407_s22 = scalar_select %p254_p7, %s1284_s11, %s256_s18  }
   0xd   : > { %p343_p10 = pnand %p1066_p6, %p342_p9 }
   0xe   : > { %p397_p11 = scmp.lt.s32.totalorder (!%p343_p10), %s1288_s12, 1  ;;  %s394_s15 = sand.u32 (!%p343_p10), 1, %s1280_s10  }
   0xf   : > { %346 = sbr.rel (%p343_p10) target bundleno = 975 (0x3cf), region = 56  ;;  %s1507_s27 = scalar_lea.sflag (!%p343_p10), [#allocation3], %s394_s15 }
  0x14   : > { %s1411_s23 = scalar_select %p397_p11, %s1288_s12, 1  ;;  %vm426_vm0 = vcmask 1042432   ;;  %vm436_vm1 = vcmask 23552   ;;  %v1298_v7 = vmov 0.0   ;;  %vm1299_vm2 = vmmov 0  }
  0x15   : > { %1116 = vmatprep.subr.bf16.mxu1 %v1298_v7  ;;  %1118 = vmatprep.mubr.msk.bf16.mxu1 %vm1299_vm2, %v1298_v7  ;;  %v535_v28 = vlaneseq  ;;  %vm637_vm15 = vcmask 130048  }
  0x16   : > { %s1068_s24 = sshll.u32 %s1411_s23, 2  ;;  %s1094_s25 = sshll.u32 %s1411_s23, 4 }
  0x17   : > { %s403_s28 = scalar_lea.vmem %s1552_s0, %s1068_s24  ;;  %s408_s16 = scalar_lea.vmem %s1553_s1, %s1094_s25  ;;  %v536_v31 = vshrl.u32 %v535_v28, 7 }
  0x18   : > { %v422_v0 = vld [vmem:[%s403_s28] sm:$0x7]  ;;  %v424_v2 = vld [vmem:[%s408_s16 + $0x8] sm:$0xff]  ;;  %s1095_s18 = sshll.u32 %s1411_s23, 3  ;;  %s415_s29 = scalar_lea.vmem %s1554_s2, %s1068_s24 }
  0x19   : > { %v423_v1 = vld [vmem:[%s408_s16] sm:$0xff]  ;;  %1111 = vmatprep.subr.msk.mxu0 %vm426_vm0, %v422_v0  ;;  %v435_v4 = vmul.f32 %v424_v2, %v424_v2  ;;  %v425_v8 = vmul.f32 %v422_v0, %v422_v0  ;;  %s1431_s26 = scalar_lea.vmem %s1555_s3, %s1095_s18  ;;  %v537_v34 = vadd.s32 8, %v536_v31  ;;  %v1435_v37 = vcvt.s32.f32 %v536_v31  ;;  %s1067_s16 = sshll.u32 %s394_s15, 4 }
  0x1a   : > { %v434_v3 = vmul.f32 %v423_v1, %v423_v1  ;;  %1113 = vmatprep.mubr.msk.f32.mxu0 %vm436_vm1, %v423_v1  ;;  %1112 = vmatpush3.msk.msra.mxu0 %vm426_vm0, %v422_v0  ;;  %s396_s18 = scalar_lea.vmem [#allocation2], %s1067_s16  ;;  %s1096_s23 = sshll.u32 %s1288_s12, 8 }
  0x1b   : > { %1114 = vmatmul.mubr.msk.f32.vlgmr.msra.gmra.mxu0 %vm436_vm1, %v424_v2  ;;  %v440_v6 = vsel %vm436_vm1, %v435_v4, 0.0  ;;  %v427_v9 = vsel %vm426_vm0, %v425_v8, 0.0  ;;  %v1437_v38 = vcvt.s32.f32 %v537_v34  ;;  %s948_s20 = sshll.u32 %s396_s18, 4  ;;  %s1301_s28 = smov [#allocation2]   ;;  %s1500_s20 = int_to_ptr.vmem [resolvable:$true] %s948_s20 }
  0x1c   : > { %v437_v5 = vsel %vm436_vm1, %v434_v3, 0.0  ;;  %v428_v10 = vrot.slane %v427_v9, 4  ;;  %vm776_vm1 = vcmask 48128   ;;  %s1220_s12 = scalar_lea.vmem %s1500_s20, 256 }
  0x1d   : > { %438 = vadd.xlane.f32.xlu0 %v437_v5  ;;  %p1221_p12 = scmp.ne.s32.totalorder %s1500_s20, %s1220_s12 }
  0x1e   : > { %v429_v11 = vadd.f32 %v428_v10, %v427_v9 }
  0x1f   : > { %p1222_p13 = pnand %p1221_p12, %p1394_p4 }
  0x20   : > { %v430_v12 = vrot.slane %v429_v11, 2 }
  0x21   : > { %441 = vadd.xlane.f32.xlu0 %v440_v6  ;;  %p1223_p0 = pneg %p1222_p13 }
  0x22   : > { %v431_v13 = vadd.f32 %v430_v12, %v429_v11 }
  0x24   : > { %v432_v15 = vrot.slane %v431_v13, 1 }
  0x26   : > { %v433_v17 = vadd.f32 %v432_v15, %v431_v13 }
  0xa6   : > { %v439_v14 = vpop.xlane.xlu0 %438 }
  0xa7   : > { %v527_v22 = vadd.f32 %v439_v14, %v433_v17 }
  0xaa   : > { %v442_v16 = vpop.xlane.xlu0 %441 }
  0xab   : > { %v528_v18 = vadd.f32 %v442_v16, %v433_v17 }
  0xdb   : > { %v1115_v19 = vpop.f32.mrf.mxu0 }
  0xdc   : > { %v530_v20 = vmul.f32 2.0, %v1115_v19 }
  0xdd   : > { %v518_v21 = vpop.f32.mrf.mxu0 }
  0xde   : > { %v532_v23 = vsub.f32 %v528_v18, %v530_v20  ;;  %v529_v24 = vmul.f32 2.0, %v518_v21 }
  0xe0   : > { %v531_v25 = vsub.f32 %v527_v22, %v529_v24  ;;  %v534_v26 = vmax.f32 %v532_v23, 0.0 }
  0xe2   : > { %v533_v27 = vmax.f32 %v531_v25, 0.0 }
  0xe4   : > { %v540_v29 = vmin.f32 %v533_v27, %v534_v26 }
  0xe6   : > { %v541_v30 = vrot.slane %v540_v29, 4 }
  0xe8   : > { %v542_v32 = vmin.f32 %v540_v29, %v541_v30 }
  0xea   : > { %v543_v33 = vrot.slane %v542_v32, 2 }
  0xec   : > { %v544_v35 = vmin.f32 %v542_v32, %v543_v33 }
  0xee   : > { %v545_v36 = vrot.slane %v544_v35, 1 }
  0xf0   : > { %v546_v39 = vmin.f32 %v544_v35, %v545_v36 }
  0xf2   : > { %vm547_vm3 = vcmp.eq.f32.partialorder %v533_v27, %v546_v39  ;;  %vm548_vm4 = vcmp.eq.f32.partialorder %v534_v26, %v546_v39  ;;  %v560_v40 = vadd.f32 1e-08, %v546_v39 }
  0xf3   : > { %v549_v41 = vsel %vm547_vm3, %v1435_v37, 16.0  ;;  %v550_v42 = vsel %vm548_vm4, %v1437_v38, 16.0  ;;  %vm706_vm3 = vcmask 80896  }
  0xf4   : > { %v551_v43 = vmin.f32 %v549_v41, %v550_v42  ;;  %1212 = vrcp.f32 %v560_v40 }
  0xf6   : > { %v552_v44 = vrot.slane %v551_v43, 4 }
  0xf8   : > { %v553_v45 = vmin.f32 %v551_v43, %v552_v44 }
  0xfa   : > { %v554_v46 = vrot.slane %v553_v45, 2 }
  0xfc   : > { %v555_v47 = vmin.f32 %v553_v45, %v554_v46  ;;  %v1206_v46 = vld [vmem:[%s1431_s26] sm:$0x1f]   ;;  %s1505_s26 = scalar_lea.hbm %s1561_s9, %s1096_s23 }
  0xfe   : > { %v556_v48 = vrot.slane %v555_v47, 1 }
 0x100   : > { %v557_v49 = vmin.f32 %v555_v47, %v556_v48  ;;  %v1207_v47 = vld [vmem:[%s1556_s4] sm:$0xff]   ;;  %v1208_v48 = vld [vmem:[%s1556_s4 + $0x8] sm:$0xff]  }
 0x101   : > { %v1213_v50 = vpop.eup %1212 }
 0x102   : > { %vm558_vm5 = vcmp.eq.f32.partialorder %v1435_v37, %v557_v49  ;;  %vm559_vm6 = vcmp.eq.f32.partialorder %v1437_v38, %v557_v49  ;;  %v1209_v49 = vld [vmem:[%s1557_s5] sm:$0xff]  }
 0x103   : > { %v567_v51 = vsel %vm558_vm5, inf, %v533_v27  ;;  %v562_v52 = vsel %vm558_vm5, %v1213_v50, 0.0  ;;  %v563_v53 = vsel %vm559_vm6, %v1213_v50, 0.0  ;;  %v568_v54 = vsel %vm559_vm6, inf, %v534_v26  ;;  %1124 = vmatprep.mubr.msk.bf16.mxu0 %vm706_vm3, %v1209_v49 }
 0x104   : > { %v569_v55 = vmin.f32 %v567_v51, %v568_v54 }
 0x106   : > { %v570_v56 = vrot.slane %v569_v55, 4 }
 0x108   : > { %v571_v57 = vmin.f32 %v569_v55, %v570_v56  ;;  %v865_v55 = vld [vmem:[%s1560_s8] sm:$0xff]  ;;  %v866_v56 = vld [vmem:[%s1560_s8 + $0x8] sm:$0xff] }
 0x10a   : > { %v572_v58 = vrot.slane %v571_v57, 2 }
 0x10c   : > { %v573_v59 = vmin.f32 %v571_v57, %v572_v58 }
 0x10e   : > { %v574_v60 = vrot.slane %v573_v59, 1 }
 0x110   : > { %v575_v61 = vmin.f32 %v573_v59, %v574_v60 }
 0x112   : > { %vm576_vm7 = vcmp.eq.f32.partialorder %v567_v51, %v575_v61  ;;  %vm577_vm8 = vcmp.eq.f32.partialorder %v568_v54, %v575_v61  ;;  %v589_v62 = vadd.f32 1e-08, %v575_v61 }
 0x113   : > { %v578_v63 = vsel %vm576_vm7, %v1435_v37, 16.0  ;;  %v579_v0 = vsel %vm577_vm8, %v1437_v38, 16.0 }
 0x114   : > { %v580_v1 = vmin.f32 %v578_v63, %v579_v0  ;;  %1214 = vrcp.f32 %v589_v62  ;;  %v1210_v63 = vld [vmem:[%s1557_s5 + $0x8] sm:$0xff]  }
 0x116   : > { %v581_v2 = vrot.slane %v580_v1, 4 }
 0x118   : > { %v582_v3 = vmin.f32 %v580_v1, %v581_v2 }
 0x11a   : > { %v583_v4 = vrot.slane %v582_v3, 2 }
 0x11c   : > { %v584_v5 = vmin.f32 %v582_v3, %v583_v4 }
 0x11e   : > { %v585_v6 = vrot.slane %v584_v5, 1 }
 0x120   : > { %v586_v8 = vmin.f32 %v584_v5, %v585_v6 }
 0x121   : > { %v1215_v9 = vpop.eup %1214 }
 0x122   : > { %vm587_vm9 = vcmp.eq.f32.partialorder %v1435_v37, %v586_v8  ;;  %vm588_vm10 = vcmp.eq.f32.partialorder %v1437_v38, %v586_v8  ;;  %v595_v32 = vadd.f32 %v1215_v9, %v1213_v50  ;;  %v693_v50 = vld [vmem:[%s1558_s6 + $0x10] sm:$0xff] }
 0x123   : > { %v591_v10 = vsel %vm587_vm9, %v1215_v9, 0.0  ;;  %v592_v11 = vsel %vm588_vm10, %v1215_v9, 0.0  ;;  %v596_v12 = vsel %vm587_vm9, inf, %v567_v51  ;;  %v597_v13 = vsel %vm588_vm10, inf, %v568_v54  ;;  %v692_v54 = vld [vmem:[%s1558_s6 + $0x8] sm:$0xff] }
 0x124   : > { %v593_v14 = vadd.f32 %v591_v10, %v562_v52  ;;  %v594_v15 = vadd.f32 %v592_v11, %v563_v53  ;;  %v598_v16 = vmin.f32 %v596_v12, %v597_v13  ;;  %v1300_v51 = vmov 0   ;;  %v691_v52 = vld [vmem:[%s1558_s6] sm:$0xff]  ;;  %v694_v53 = vld [vmem:[%s1558_s6 + $0x18] sm:$0xff] }
 0x125   : > { %1204 = vset.pattern.permute.xlu1 %v1300_v51  ;;  %1205 = vset.pattern.permute.xlu0 %v1300_v51 }
 0x126   : > { %v599_v17 = vrot.slane %v598_v16, 4  ;;  %847 = vperm.xlu1 %1204, %v693_v50   ;;  %837 = vperm.xlu0 %1205, %v691_v52  }
 0x128   : > { %v600_v18 = vmin.f32 %v598_v16, %v599_v17 }
 0x12a   : > { %v601_v19 = vrot.slane %v600_v18, 2  ;;  %852 = vperm.xlu1 %1204, %v694_v53  }
 0x12c   : > { %v602_v20 = vmin.f32 %v600_v18, %v601_v19 }
 0x12e   : > { %v603_v21 = vrot.slane %v602_v20, 1  ;;  %842 = vperm.xlu1 %1204, %v692_v54  }
 0x130   : > { %v604_v22 = vmin.f32 %v602_v20, %v603_v21 }
 0x132   : > { %vm605_vm11 = vcmp.eq.f32.partialorder %v596_v12, %v604_v22  ;;  %vm606_vm12 = vcmp.eq.f32.partialorder %v597_v13, %v604_v22  ;;  %v618_v23 = vadd.f32 1e-08, %v604_v22  ;;  %871 = vperm.xlu1 %1204, %v865_v55  }
 0x133   : > { %v607_v24 = vsel %vm605_vm11, %v1435_v37, 16.0  ;;  %v608_v25 = vsel %vm606_vm12, %v1437_v38, 16.0 }
 0x134   : > { %v609_v26 = vmin.f32 %v607_v24, %v608_v25  ;;  %1216 = vrcp.f32 %v618_v23 }
 0x136   : > { %v610_v27 = vrot.slane %v609_v26, 4  ;;  %876 = vperm.xlu1 %1204, %v866_v56  }
 0x138   : > { %v611_v28 = vmin.f32 %v609_v26, %v610_v27  ;;  %v1211_v27 = vld [vmem:[%s1559_s7] sm:$0xff]  }
 0x13a   : > { %v612_v29 = vrot.slane %v611_v28, 2 }
 0x13c   : > { %v613_v30 = vmin.f32 %v611_v28, %v612_v29 }
 0x13e   : > { %v614_v31 = vrot.slane %v613_v30, 1 }
 0x140   : > { %v615_v33 = vmin.f32 %v613_v30, %v614_v31 }
 0x141   : > { %v1217_v34 = vpop.eup %1216 }
 0x142   : > { %vm616_vm13 = vcmp.eq.f32.partialorder %v1435_v37, %v615_v33  ;;  %vm617_vm14 = vcmp.eq.f32.partialorder %v1437_v38, %v615_v33  ;;  %v624_v35 = vadd.f32 %v1217_v34, %v595_v32  ;;  %v682_v37 = vld [vmem:[%s415_s29] sm:$0x7]  ;;  %s1224_s29 = sshll.u32 %s1301_s28, 4  ;;  %s1225_s29 = int_to_ptr.vmem [resolvable:$false] %s1224_s29 }
 0x143   : > { %v620_v36 = vsel %vm616_vm13, %v1217_v34, 0.0  ;;  %v621_v39 = vsel %vm617_vm14, %v1217_v34, 0.0  ;;  %v784_v38 = vsel %vm426_vm0, %v682_v37, 0  ;;  %s1226_s16 = scalar_lea.vmem %s1225_s29, 512  ;;  %p1227_p1 = scmp.lt.s32.totalorder %s1500_s20, %s1225_s29 }
 0x144   : > { %v622_v40 = vadd.f32 %v620_v36, %v593_v14  ;;  %v623_v41 = vadd.f32 %v621_v39, %v594_v15  ;;  %1218 = vrcp.f32 %v624_v35  ;;  %p1228_p2 = scmp.lt.s32.totalorder %s1226_s16, %s1220_s12 }
 0x146   : > { %p1229_p3 = por %p1228_p2, %p1227_p1 }
 0x148   : > { %p1230_p5 = pnand %p1229_p3, %p1223_p0 }
 0x151   : > { %v1219_v42 = vpop.eup %1218 }
 0x152   : > { %v627_v43 = vmul.f32 %v1219_v42, %v622_v40  ;;  %v628_v44 = vmul.f32 %v1219_v42, %v623_v41 }
 0x154   : > { %v631_v45 = vpack.c.bf16 %v628_v44, %v627_v43 }
 0x156   : > { %1117 = vmatpush3.bf16.msra.mxu1 %v631_v45 }
 0x157   : > { %1143 = vmatprep.subr.msk.bf16.mxu1 %vm426_vm0, %v682_v37  ;;  %vm713_vm0 = vcmask 1044480  }
 0x159   : > { %1119 = vmatmul.mubr.msk.bf16.vlgmr.msra.gmra.mxu1 %vm637_vm15, %v1206_v46 }
 0x15a   : > { %1129 = vmatpush3.bf16.msra.mxu1 %v784_v38  ;;  %1130 = vmatprep.mubr.msk.bf16.mxu1 %vm776_vm1, %v1207_v47 }
 0x161   : > { %1131 = vmatmul.mubr.msk.bf16.vlgmr.msra.gmra.mxu1 %vm776_vm1, %v1208_v48 }
 0x1a1   : > { %v848_v1 = vpop.permute.xlu1 %847  ;;  %v838_v14 = vpop.permute.xlu0 %837 }
 0x1a5   : > { %v853_v6 = vpop.permute.xlu1 %852 }
 0x1a9   : > { %v843_v18 = vpop.permute.xlu1 %842 }
 0x1ad   : > { %v872_v28 = vpop.permute.xlu1 %871 }
 0x219   : > { %v675_v57 = vpop.f32.mrf.mxu1 }
 0x21b   : > { %v1120_v58 = vpop.f32.mrf.mxu1 }
 0x21d   : > { %v678_v59 = vpop.f32.mrf.mxu1 }
 0x21e   : > { %v695_v60 = vpack.c.bf16 %v678_v59, %v675_v57 }
 0x21f   : > { %v1121_v61 = vpop.f32.mrf.mxu1 }
 0x220   : > { %v715_v62 = vsel %vm713_vm0, %v695_v60, 0  ;;  %1142 = vmatprep.subr.msk.bf16.mxu0 %vm713_vm0, %v695_v60 }
 0x221   : > { %1123 = vmatpush3.bf16.msra.mxu0 %v715_v62  ;;  %v1132_v0 = vpop.f32.mrf.mxu1 }
 0x222   : > { %1134 = vmatprep.subr.bf16.mxu0 %v1298_v7 }
 0x223   : > { %v820_v2 = vpop.f32.mrf.mxu1 }
 0x224   : > { %1125 = vmatmul.mubr.msk.bf16.vlgmr.msra.gmra.mxu0 %vm706_vm3, %v1210_v63 }
 0x225   : > { %1138 = vmatprep.mubr.msk.bf16.mxu0 %vm1299_vm2, %v1298_v7  ;;  %v1133_v4 = vpop.f32.mrf.mxu1  ;;  %vm884_vm2 = vcmask 261120  }
 0x227   : > { %v823_v11 = vpop.f32.mrf.mxu1 }
 0x2e4   : > { %v1126_v3 = vpop.f32.mrf.mxu0 }
 0x2e5   : > { %v829_v5 = vadd.f32 %v1132_v0, %v1126_v3 }
 0x2e6   : > { %v751_v8 = vpop.f32.mrf.mxu0 }
 0x2e7   : > { %v857_v10 = vadd.f32 %v848_v1, %v829_v5  ;;  %v821_v12 = vadd.f32 %v820_v2, %v751_v8 }
 0x2e8   : > { %v1127_v9 = vpop.f32.mrf.mxu0 }
 0x2e9   : > { %v832_v13 = vadd.f32 %v1133_v4, %v1127_v9  ;;  %v861_v19 = vmax.f32 %v857_v10, 0.0  ;;  %v855_v20 = vadd.f32 %v838_v14, %v821_v12 }
 0x2ea   : > { %v754_v15 = vpop.f32.mrf.mxu0 }
 0x2eb   : > { %v858_v16 = vadd.f32 %v853_v6, %v832_v13  ;;  %v824_v17 = vadd.f32 %v823_v11, %v754_v15  ;;  %v859_v25 = vmax.f32 %v855_v20, 0.0 }
 0x2ed   : > { %v862_v21 = vmax.f32 %v858_v16, 0.0  ;;  %v856_v22 = vadd.f32 %v843_v18, %v824_v17 }
 0x2ef   : > { %v868_v23 = vpack.c.bf16 %v862_v21, %v861_v19  ;;  %v860_v24 = vmax.f32 %v856_v22, 0.0 }
 0x2f1   : > { %1135 = vmatpush3.bf16.msra.mxu0 %v868_v23  ;;  %v867_v26 = vpack.c.bf16 %v860_v24, %v859_v25 }
 0x2f2   : > { %1136 = vmatprep.subr.bf16.mxu0 %v1298_v7  ;;  %v877_v7 = vpop.permute.xlu1 %876 }
 0x2f5   : > { %1137 = vmatpush3.bf16.msra.mxu0 %v867_v26 }
 0x2f8   : > { %1139 = vmatmul.mubr.msk.bf16.vlgmr.msra.gmra.mxu0 %vm884_vm2, %v1211_v27 }
 0x3b8   : > { %v922_v29 = vpop.f32.mrf.mxu0 }
 0x3b9   : > { %v923_v30 = vadd.f32 %v922_v29, %v872_v28 }
 0x3ba   : > { %v1140_v31 = vpop.f32.mrf.mxu0 }
 0x3bb   : > { %v929_v32 = vmax.f32 %v923_v30, 0.0 }
 0x3bc   : > { %v925_v33 = vpop.f32.mrf.mxu0 }
 0x3bd   : > { %931 = vst [vmem:[%s396_s18] sm:$0xff] %v929_v32  ;;  %v926_v34 = vadd.f32 %v925_v33, %v877_v7 }
 0x3be   : > { %v1141_v35 = vpop.f32.mrf.mxu0 }
 0x3bf   : > { %v930_v36 = vmax.f32 %v926_v34, 0.0 }
 0x3c1   : > { %932 = vst [vmem:[%s396_s18 + $0x8] sm:$0xff] %v930_v36 }
 0x3c2   : > { %1233 = shalt.err (!%p1230_p5)
}
 0x3c3   : > { %s1234_s15 = scalar_lea.hbm %s1505_s26, 256  ;;  %s1238_s25 = scalar_lea.hbm %s1561_s9, 512 }
 0x3c4   : > { %p1235_p6 = scmp.ne.s32.totalorder %s1505_s26, %s1234_s15  ;;  %p1239_p10 = scmp.lt.s32.totalorder %s1505_s26, %s1561_s9 }
 0x3c5   : > { %p1240_p11 = scmp.lt.s32.totalorder %s1238_s25, %s1234_s15 }
 0x3c6   : > { %p1236_p7 = pnand %p1235_p6, %p1394_p4 }
 0x3c7   : > { %p1241_p12 = por %p1240_p11, %p1239_p10 }
 0x3c8   : > { %p1237_p9 = pneg %p1236_p7 }
 0x3ca   : > { %p1242_p13 = pnand %p1241_p12, %p1237_p9 }
 0x3cc   : > { %1245 = shalt.err (!%p1242_p13)
}
 0x3cd   : > { %s1302_s12 = smov 128   ;;  %s1303_s29 = smov 8  }
 0x3ce   : > { %1144 = dma.vmem_to_hbm [thread:$0]  (%p1394_p4), %s1500_s20, 256, %s1505_s26, %s1507_s27, %s1302_s12, %s1302_s12, %s1303_s29  }
 0x3cf PF: > { %p1150_p0 = scmp.ge.s32.totalorder %s1296_s14, 2  ;;  %s963_s16 = sand.u32 1, %s1276_s30  }
 0x3d0   : > { %s964_s15 = scalar_lea.sflag [#allocation3], %s963_s16 }
 0x3d1   : > { %p1147_p1 = pnand %p1150_p0, %p1401_p8 }
 0x3d3   : > { %p1148_p2 = pneg %p1147_p1 }
 0x3d5   : > { %1271 = dma.done.wait (%p1148_p2), %s964_s15, 256  }
 0x3d6   : > { %1273 = vsyncadd (%p1148_p2), %s964_s15, 4294967040  ;;  %s22_s14 = sadd.s32 1, %s1296_s14   ;;  %s1564_s30 = smov %s1280_s10 }
 0x3d7   : > { %p19_p3 = scmp.ge.s32.totalorder %s22_s14, 4   ;;  %s1565_s10 = smov %s1284_s11 }
 0x3d8   : > { %s1566_s11 = smov %s1407_s22  ;;  %s1567_s12 = smov %s1292_s13 }
 0x3d9   : > { %s1568_s13 = smov %s1570_s17  ;;  %21 = sbr.rel (!%p19_p3) target bundleno = 4 (0x4), region = 100 }
 0x3de   :  { %969 = vsyncpa [#allocation3], 1 }
 0x3df   :  { %971 = vsyncpa [#allocation3 + $0x1], 1 }

</bundles_post_ra>
